<compile_context>
chip_gen: v7x
topology: tpu7x:2x2x1
jax: 0.10.0
libtpu: 0.0.40
codegen_flags: <defaults>
</compile_context>

<pallas_src>
import itertools
import numpy as np
import jax
import jax.numpy as jnp
from jax.experimental import pallas as pl
from jax.experimental.pallas import tpu as pltpu


def _round_up(x, m):
    return ((x + m - 1) // m) * m


def _build_selection(mf_counts, combinations, n_mfs):
    """Precompute (plain numpy glue) the fused one-hot gather matrix.

    Returns
      W:        (Dp, max_K * R_pad) bfloat16 one-hot selectors.
                Column v*R_pad + r of slice v selects the MF value used by
                rule r in product-slot v; padding slots select the constant-1
                feature at row index D (= n_in*n_mfs); padded rule columns are
                all-zero (sliced off later).
      n_rules, r_pad, max_k, dp
    """
    n_in = len(mf_counts)
    d = n_in * n_mfs
    dp = _round_up(d + 1, 128)            # +1 = constant-1.0 feature column

    sub_rules = []
    for comb in combinations:
        counts = [mf_counts[i] for i in comb]
        sub_rules.append(list(itertools.product(*[range(c) for c in counts])))
    n_rules = sum(len(s) for s in sub_rules)
    max_k = max(len(c) for c in combinations)
    r_pad = _round_up(n_rules, 128)

    W = np.zeros((dp, max_k * r_pad), dtype=np.float32)
    r = 0
    for comb, rules in zip(combinations, sub_rules):
        k = len(comb)
        for rule in rules:
            for v in range(max_k):
                if v < k:
                    W[comb[v] * n_mfs + rule[v], v * r_pad + r] = 1.0
                else:
                    W[d, v * r_pad + r] = 1.0   # neutral 1.0 for the product
            r += 1
    return jnp.asarray(W, dtype=jnp.bfloat16), n_rules, r_pad, max_k, dp


def _antecedent_kernel(x_ref, w_ref, o_ref):
    # x_ref: (TM, Dp) bf16   w_ref: (Dp, K*Rp) bf16   o_ref: (TM, Rp) f32
    rp = o_ref.shape[-1]
    k = w_ref.shape[-1] // rp
    # One wide MXU matmul performs all K one-hot gathers at once, accumulating
    # in f32 (each output column has exactly one non-zero selector -> exact).
    y = jnp.dot(x_ref[...], w_ref[...], preferred_element_type=jnp.float32)
    # Product over the K lane-aligned (TM, Rp) slices (static tiny unroll; the
    # slices are 128-lane aligned so this is pure VPU work, no XLU traffic).
    acc = y[:, 0:rp]
    for v in range(1, k):
        acc = acc * y[:, v * rp:(v + 1) * rp]
    o_ref[...] = acc.astype(o_ref.dtype)


def antecedent_forward(x, W, n_rules, r_pad, dp, *, tm_max=512):
    """x: (n_cases, n_in, n_mfs) -> (n_cases, n_rules) fire strengths."""
    n_cases, n_in, n_mfs = x.shape
    d = n_in * n_mfs
    max_k = W.shape[1] // r_pad

    # Batch tile: multiple of 16 (bf16 sublane pack), capped at tm_max.
    tm = min(tm_max, _round_up(n_cases, 16))
    b_pad = _round_up(n_cases, tm)

    # Flatten, cast to bf16 (exact here: x is pre-rounded to bf16), append the
    # constant-1.0 feature column, pad features to Dp and batch to b_pad.
    # TODO(synk): if production membership values are not bf16-exact, switch
    # the matmul to f32 inputs with precision=HIGHEST (3x MXU cost).
    x_flat = x.reshape(n_cases, d).astype(jnp.bfloat16)
    ones_col = jnp.ones((n_cases, 1), dtype=jnp.bfloat16)
    x_aug = jnp.concatenate([x_flat, ones_col], axis=1)          # (B, d+1)
    x_aug = jnp.pad(x_aug, ((0, b_pad - n_cases), (0, dp - (d + 1))))

    grid = (b_pad // tm,)
    out = pl.pallas_call(
        _antecedent_kernel,
        out_shape=jax.ShapeDtypeStruct((b_pad, r_pad), jnp.float32),
        grid_spec=pltpu.PrefetchScalarGridSpec(
            num_scalar_prefetch=0,
            grid=grid,
            in_specs=[
                pl.BlockSpec((tm, dp), lambda i: (i, 0)),             # x tile
                pl.BlockSpec((dp, max_k * r_pad), lambda i: (0, 0)),  # W resident
            ],
            out_specs=pl.BlockSpec((tm, r_pad), lambda i: (i, 0)),
        ),
        compiler_params=pltpu.CompilerParams(
            dimension_semantics=("parallel",),
        ),
        cost_estimate=pl.CostEstimate(
            flops=2 * b_pad * dp * max_k * r_pad,
            transcendentals=0,
            bytes_accessed=(x_aug.size * 2 + W.size * 2 + b_pad * r_pad * 4),
        ),
    )(x_aug, W)
    return out[:n_cases, :n_rules]


def antecedent_reference(x, mf_counts, combinations):
    """Pure numpy reference matching the PyTorch forward (gather + prod + cat)."""
    x = np.asarray(x)
    outs = []
    for comb in combinations:
        counts = [mf_counts[i] for i in comb]
        rules = list(itertools.product(*[range(c) for c in counts]))
        cols = []
        for rule in rules:
            vals = np.ones(x.shape[0], dtype=np.float32)
            for var, mf in zip(comb, rule):
                vals = vals * x[:, var, mf]
            cols.append(vals)
        outs.append(np.stack(cols, axis=1))
    return np.concatenate(outs, axis=1)


if __name__ == "__main__":
    # Synthetic AntecedentLayer config: 4 fuzzy variables with these MF counts,
    # rules formed over these variable subsets (the `combinations` argument).
    mf_counts = [3, 2, 3, 2]
    combinations = [(0, 1), (2, 3), (0, 2, 3)]
    n_in = len(mf_counts)
    n_mfs = max(mf_counts)      # trailing dim of x, as in the ANFIS pipeline
    n_cases = 8

    key = jax.random.PRNGKey(0)
    x = jax.random.uniform(key, (n_cases, n_in, n_mfs), dtype=jnp.float32)
    # Membership values are pre-rounded to bf16 so the bf16 MXU gather is
    # bit-exact versus the f32 reference.
    x = x.astype(jnp.bfloat16).astype(jnp.float32)

    W, n_rules, r_pad, max_k, dp = _build_selection(mf_counts, combinations, n_mfs)

    out = antecedent_forward(x, W, n_rules, r_pad, dp)
    out = jax.block_until_ready(out)

    ref = antecedent_reference(x, mf_counts, combinations)
    np.testing.assert_allclose(np.asarray(out), ref, rtol=1e-6, atol=1e-6)
    print("KERNEL_OK")
</pallas_src>

<mosaic_0001>
module attributes {stable_mosaic.version = 11 : i64} {
  func.func @_antecedent_kernel(%arg0: i32, %arg1: memref<16x128xbf16, #tpu.memory_space<vmem>>, %arg2: memref<128x384xbf16, #tpu.memory_space<vmem>>, %arg3: memref<16x128xf32, #tpu.memory_space<vmem>>) attributes {dimension_semantics = [#tpu.dimension_semantics<parallel>], iteration_bounds = array<i64: 1>, scalar_prefetch = 0 : i64, scratch_operands = 0 : i64, tpu.core_type = #tpu.core_type<tc>, window_params = [{transform_indices = @transform_0, window_bounds = array<i64: 16, 128>}, {pipeline_mode = #tpu.pipeline_mode<synchronous>, transform_indices = @transform_1, window_bounds = array<i64: 128, 384>}, {transform_indices = @transform_2, window_bounds = array<i64: 16, 128>}]} {
    %c0 = arith.constant 0 : index
    %c0_0 = arith.constant 0 : index
    %0 = vector.load %arg1[%c0, %c0_0] : memref<16x128xbf16, #tpu.memory_space<vmem>>, vector<16x128xbf16>
    %c0_1 = arith.constant 0 : index
    %c0_2 = arith.constant 0 : index
    %1 = vector.load %arg2[%c0_1, %c0_2] : memref<128x384xbf16, #tpu.memory_space<vmem>>, vector<128x384xbf16>
    %cst = arith.constant dense<0.000000e+00> : vector<16x384xf32>
    %2 = tpu.matmul %0, %1, %cst {dimension_numbers = #tpu.dot_dimension_numbers<[1], [0], [0], [1], [0, 0, 1, 1], [], []>} : vector<16x128xbf16>, vector<128x384xbf16>, vector<16x384xf32> -> vector<16x384xf32>
    %3 = vector.extract_strided_slice %2 {offsets = [0, 0], sizes = [16, 128], strides = [1, 1]} : vector<16x384xf32> to vector<16x128xf32>
    %4 = vector.extract_strided_slice %2 {offsets = [0, 128], sizes = [16, 128], strides = [1, 1]} : vector<16x384xf32> to vector<16x128xf32>
    %5 = arith.mulf %3, %4 : vector<16x128xf32>
    %6 = vector.extract_strided_slice %2 {offsets = [0, 256], sizes = [16, 128], strides = [1, 1]} : vector<16x384xf32> to vector<16x128xf32>
    %7 = arith.mulf %5, %6 : vector<16x128xf32>
    %c0_3 = arith.constant 0 : index
    %c0_4 = arith.constant 0 : index
    %8 = vector.load %arg3[%c0_3, %c0_4] : memref<16x128xf32, #tpu.memory_space<vmem>>, vector<16x128xf32>
    tpu.vector_store %arg3[%c0_3, %c0_4], %7 {strides = array<i32>} : memref<16x128xf32, #tpu.memory_space<vmem>>, vector<16x128xf32>,
    return
  }
  func.func @transform_0(%arg0: i32) -> (i32, i32) {
    %c0_i32 = arith.constant 0 : i32
    %c0_i32_0 = arith.constant 0 : i32
    return %arg0, %c0_i32 : i32, i32
  }
  func.func @transform_1(%arg0: i32) -> (i32, i32) {
    %c0_i32 = arith.constant 0 : i32
    %c0_i32_0 = arith.constant 0 : i32
    %c0_i32_1 = arith.constant 0 : i32
    return %c0_i32, %c0_i32_0 : i32, i32
  }
  func.func @transform_2(%arg0: i32) -> (i32, i32) {
    %c0_i32 = arith.constant 0 : i32
    %c0_i32_0 = arith.constant 0 : i32
    return %arg0, %c0_i32 : i32, i32
  }
}

</mosaic_0001>

<bundles_post_ra>
// kernel: tpu_custom_call.1
= control target key start
LH: loop header
LB: loop body
LE: loop exit
PB: predicated region body
PF: predicated region fallthrough
CT: control target
= control target key end

     0   :  { %7 = vsyncpa [#allocation3], 0  ;;  %s551_s0 = inlined_call_operand.hbm [shape: bf16[16,128], index: 0, kind: input, shape index: {}]   ;;  %s552_s1 = inlined_call_operand.hbm [shape: bf16[128,384], index: 1, kind: input, shape index: {}]   ;;  %s553_s2 = inlined_call_operand.hbm [shape: f32[16,128], index: 2, kind: output, shape index: {}]  }
   0x1   :  { %8 = vsyncpa [#allocation6], 0 }
   0x2   :  { %9 = vsyncpa [#allocation4], 0  ;;  %s488_s9 = smov [#allocation2]   ;;  %s416_s13 = scalar_lea.hbm %s551_s0, 128 }
   0x3   :  { %s15_s10 = sshll.u32 %s488_s9, 4  ;;  %p417_p0 = scmp.ne.s32.totalorder %s551_s0, %s416_s13  ;;  %s16_s10 = int_to_ptr.vmem [resolvable:$true] %s15_s10 }
   0x4   :  { %p420_p1 = scmp.lt.u32.totalorder %s416_s13, %s551_s0 }
   0x6   :  { %p422_p2 = pnand %p420_p1, %p417_p0 }
   0x8   :  { %425 = shalt.err (!%p422_p2)
}
   0x9   :  { %s426_s18 = scalar_lea.vmem %s16_s10, 128  ;;  %p431_p4 = scmp.lt.s32.totalorder %s16_s10, %s16_s10 }
   0xa   :  { %p427_p3 = scmp.ne.s32.totalorder %s16_s10, %s426_s18  ;;  %p432_p5 = scmp.lt.s32.totalorder %s426_s18, %s426_s18 }
   0xc   :  { %p433_p6 = por %p432_p5, %p431_p4 }
   0xe   :  { %p434_p7 = pnand %p433_p6, %p427_p3 }
  0x10   :  { %437 = shalt.err (!%p434_p7)
}
  0x11   :  { %s489_s19 = smov 64   ;;  %s490_s20 = smov 4  }
  0x12   :  { %21 = dma.hbm_to_vmem [thread:$0]  %s551_s0, 128, %s16_s10, [#allocation3], %s489_s19, %s489_s19, %s490_s20  }
  0x13   :  { %s491_s23 = smov [#allocation5]   ;;  %s438_s27 = scalar_lea.hbm %s552_s1, 3072 }
  0x14   :  { %s27_s24 = sshll.u32 %s491_s23, 4  ;;  %p439_p8 = scmp.ne.s32.totalorder %s552_s1, %s438_s27  ;;  %s28_s24 = int_to_ptr.vmem [resolvable:$true] %s27_s24 }
  0x15   :  { %p442_p9 = scmp.lt.u32.totalorder %s438_s27, %s552_s1 }
  0x17   :  { %p444_p10 = pnand %p442_p9, %p439_p8 }
  0x19   :  { %447 = shalt.err (!%p444_p10)
}
  0x1a   :  { %s448_s4 = scalar_lea.vmem %s28_s24, 3072  ;;  %p453_p12 = scmp.lt.s32.totalorder %s28_s24, %s28_s24 }
  0x1b   :  { %p449_p11 = scmp.ne.s32.totalorder %s28_s24, %s448_s4  ;;  %p454_p13 = scmp.lt.s32.totalorder %s448_s4, %s448_s4 }
  0x1d   :  { %p455_p0 = por %p454_p13, %p453_p12 }
  0x1f   :  { %p456_p1 = pnand %p455_p0, %p449_p11 }
  0x21   :  { %459 = shalt.err (!%p456_p1)
}
  0x22   :  { %s492_s0 = smov 192   ;;  %s493_s5 = smov 12  }
  0x23   :  { %33 = dma.hbm_to_vmem [thread:$0]  %s552_s1, 3072, %s28_s24, [#allocation6], %s492_s0, %s492_s0, %s493_s5  }
  0x24   :  { %482 = dma.done.wait [#allocation3], 128  }
  0x25   :  { %483 = vsyncadd [#allocation3], 4294967168 }
  0x26   :  { %484 = dma.done.wait [#allocation6], 3072  }
  0x27   :  { %485 = vsyncadd [#allocation6], 4294964224  ;;  %v494_v0 = vmov 0.0   ;;  %v495_v1 = vmov 0   ;;  %vm496_vm0 = vmmov 0   ;;  %v415_v26 = vld [vmem:[#allocation2] sm:$0xff]  }
  0x28   :  { %351 = vmatprep.subr.bf16.mxu1 %v494_v0  ;;  %241 = vmatprep.mubr.bf16.mxu0 %v495_v1  ;;  %v383_v2 = vld [vmem:[#allocation5 + $0x4] ss:$12 sps:$4 sm:$0xff]   ;;  %v385_v3 = vld [vmem:[#allocation5] ss:$12 sps:$4 sm:$0xff]   ;;  %v386_v4 = vld [vmem:[#allocation5 + $0x8] ss:$12 sps:$4 sm:$0xff]  }
  0x29   :  { %367 = vmatprep.mubr.msk.bf16.mxu1 %vm496_vm0, %v494_v0  ;;  %209 = vmatprep.subr.bf16.mxu0 %v383_v2  ;;  %v387_v5 = vld [vmem:[#allocation5 + $0x1c] ss:$12 sps:$4 sm:$0xff]   ;;  %v389_v6 = vld [vmem:[#allocation5 + $0x18] ss:$12 sps:$4 sm:$0xff]   ;;  %v390_v7 = vld [vmem:[#allocation5 + $0x20] ss:$12 sps:$4 sm:$0xff]  }
  0x2a   :  { %210 = vmatpush1.bf16.msra.mxu0 %v385_v3  ;;  %352 = vmatpush3.bf16.msra.mxu1 %v386_v4  ;;  %v391_v8 = vld [vmem:[#allocation5 + $0x34] ss:$12 sps:$4 sm:$0xff]   ;;  %v393_v9 = vld [vmem:[#allocation5 + $0x30] ss:$12 sps:$4 sm:$0xff]   ;;  %v394_v10 = vld [vmem:[#allocation5 + $0x38] ss:$12 sps:$4 sm:$0xff]  }
  0x2b   :  { %211 = vmatprep.subr.bf16.mxu0 %v387_v5  ;;  %353 = vmatprep.subr.bf16.mxu1 %v494_v0  ;;  %v395_v11 = vld [vmem:[#allocation5 + $0x4c] ss:$12 sps:$4 sm:$0xff]   ;;  %v397_v12 = vld [vmem:[#allocation5 + $0x48] ss:$12 sps:$4 sm:$0xff]   ;;  %v398_v13 = vld [vmem:[#allocation5 + $0x50] ss:$12 sps:$4 sm:$0xff]  }
  0x2c   :  { %v399_v14 = vld [vmem:[#allocation5 + $0x64] ss:$12 sps:$4 sm:$0xff]   ;;  %v401_v15 = vld [vmem:[#allocation5 + $0x60] ss:$12 sps:$4 sm:$0xff]   ;;  %v402_v16 = vld [vmem:[#allocation5 + $0x68] ss:$12 sps:$4 sm:$0xff]  }
  0x2d   :  { %v403_v17 = vld [vmem:[#allocation5 + $0x7c] ss:$12 sps:$4 sm:$0xff]   ;;  %v405_v18 = vld [vmem:[#allocation5 + $0x78] ss:$12 sps:$4 sm:$0xff]   ;;  %v406_v19 = vld [vmem:[#allocation5 + $0x80] ss:$12 sps:$4 sm:$0xff]  }
  0x2e   :  { %212 = vmatpush1.bf16.msra.mxu0 %v389_v6  ;;  %354 = vmatpush3.bf16.msra.mxu1 %v390_v7  ;;  %v407_v20 = vld [vmem:[#allocation5 + $0x94] ss:$12 sps:$4 sm:$0xff]   ;;  %v409_v21 = vld [vmem:[#allocation5 + $0x90] ss:$12 sps:$4 sm:$0xff]   ;;  %v410_v22 = vld [vmem:[#allocation5 + $0x98] ss:$12 sps:$4 sm:$0xff]  }
  0x2f   :  { %213 = vmatprep.subr.bf16.mxu0 %v391_v8  ;;  %355 = vmatprep.subr.bf16.mxu1 %v494_v0  ;;  %v411_v23 = vld [vmem:[#allocation5 + $0xac] ss:$12 sps:$4 sm:$0xff]   ;;  %v413_v24 = vld [vmem:[#allocation5 + $0xa8] ss:$12 sps:$4 sm:$0xff]   ;;  %v414_v25 = vld [vmem:[#allocation5 + $0xb0] ss:$12 sps:$4 sm:$0xff]  }
  0x30   :  { %s497_s1 = smov [#allocation7]  }
  0x31   :  { %s304_s8 = sshll.u32 %s497_s1, 4  ;;  %s305_s8 = int_to_ptr.vmem [resolvable:$true] %s304_s8 }
  0x32   :  { %214 = vmatpush1.bf16.msra.mxu0 %v393_v9  ;;  %356 = vmatpush3.bf16.msra.mxu1 %v394_v10  ;;  %s460_s9 = scalar_lea.vmem %s305_s8, 256  ;;  %p465_p3 = scmp.lt.s32.totalorder %s305_s8, %s305_s8 }
  0x33   :  { %215 = vmatprep.subr.bf16.mxu0 %v395_v11  ;;  %357 = vmatprep.subr.bf16.mxu1 %v494_v0  ;;  %p461_p2 = scmp.ne.s32.totalorder %s305_s8, %s460_s9  ;;  %p466_p4 = scmp.lt.s32.totalorder %s460_s9, %s460_s9 }
  0x35   :  { %p467_p5 = por %p466_p4, %p465_p3 }
  0x36   :  { %216 = vmatpush1.bf16.msra.mxu0 %v397_v12  ;;  %358 = vmatpush3.bf16.msra.mxu1 %v398_v13 }
  0x37   :  { %217 = vmatprep.subr.bf16.mxu0 %v399_v14  ;;  %359 = vmatprep.subr.bf16.mxu1 %v494_v0  ;;  %p468_p6 = pnand %p467_p5, %p461_p2 }
  0x3a   :  { %218 = vmatpush1.bf16.msra.mxu0 %v401_v15  ;;  %360 = vmatpush3.bf16.msra.mxu1 %v402_v16 }
  0x3b   :  { %219 = vmatprep.subr.bf16.mxu0 %v403_v17  ;;  %361 = vmatprep.subr.bf16.mxu1 %v494_v0 }
  0x3e   :  { %220 = vmatpush1.bf16.msra.mxu0 %v405_v18  ;;  %362 = vmatpush3.bf16.msra.mxu1 %v406_v19 }
  0x3f   :  { %221 = vmatprep.subr.bf16.mxu0 %v407_v20  ;;  %363 = vmatprep.subr.bf16.mxu1 %v494_v0 }
  0x42   :  { %222 = vmatpush1.bf16.msra.mxu0 %v409_v21  ;;  %364 = vmatpush3.bf16.msra.mxu1 %v410_v22 }
  0x43   :  { %223 = vmatprep.subr.bf16.mxu0 %v411_v23  ;;  %365 = vmatprep.subr.bf16.mxu1 %v494_v0 }
  0x46   :  { %224 = vmatpush1.bf16.msra.mxu0 %v413_v24  ;;  %366 = vmatpush3.bf16.msra.mxu1 %v414_v25 }
  0x49   :  { %242 = vmatmul.mubr.bf16.vlgmr.msra.gmra.mrb[0].mxu0 %v415_v26  ;;  %368 = vmatmul.mubr.bf16.vlgmr.msra.gmra.mrb[0].mxu1 %v415_v26 }
 0x11c   :  { %v243_v27 = vpop.f32.mrb[0].mxu0  ;;  %v286_v28 = vpop.f32.mrb[0].mxu1 }
 0x11d   :  { %v245_v29 = vpop.f32.mrb[1].mxu0  ;;  %v369_v31 = vpop.f32.mrb[1].mxu1 }
 0x11e   :  { %v293_v30 = vmul.f32 %v245_v29, %v243_v27  ;;  %v247_v32 = vpop.f32.mrb[2].mxu0  ;;  %v289_v33 = vpop.f32.mrb[2].mxu1 }
 0x11f   :  { %v249_v34 = vpop.f32.mrb[3].mxu0  ;;  %v370_v37 = vpop.f32.mrb[3].mxu1 }
 0x120   :  { %v295_v35 = vmul.f32 %v293_v30, %v286_v28  ;;  %v294_v36 = vmul.f32 %v249_v34, %v247_v32 }
 0x122   :  { %297 = vst [vmem:[#allocation7] sm:$0xff] %v295_v35  ;;  %v296_v38 = vmul.f32 %v294_v36, %v289_v33 }
 0x124   :  { %298 = vst [vmem:[#allocation7 + $0x8] sm:$0xff] %v296_v38 }
 0x125   :  { %471 = shalt.err (!%p468_p6)
}
 0x126   :  { %s472_s12 = scalar_lea.hbm %s553_s2, 256 }
 0x127   :  { %p473_p7 = scmp.ne.s32.totalorder %s553_s2, %s472_s12  ;;  %p476_p8 = scmp.lt.u32.totalorder %s472_s12, %s553_s2 }
 0x129   :  { %p478_p9 = pnand %p476_p8, %p473_p7 }
 0x12b   :  { %481 = shalt.err (!%p478_p9)
}
 0x12c   :  { %s498_s17 = smov 128   ;;  %s499_s18 = smov 8  }
 0x12d   :  { %310 = dma.vmem_to_hbm [thread:$0]  %s305_s8, 256, %s553_s2, [#allocation4], %s498_s17, %s498_s17, %s499_s18  }
 0x12e   :  { %486 = dma.done.wait [#allocation4], 256  }
 0x12f   :  { %487 = vsyncadd [#allocation4], 4294967040 }
 0x130   :  { %314 = vsyncpa [#allocation3], 1 }
 0x131   :  { %315 = vsyncpa [#allocation6], 1 }
 0x132   :  { %316 = vsyncpa [#allocation4], 1 }

</bundles_post_ra>
